<compile_context>
chip_gen: v7x
topology: tpu7x:2x2x1
jax: 0.10.0
libtpu: 0.0.40
codegen_flags: <defaults>
</compile_context>

<pallas_src>
import jax
import jax.numpy as jnp
from jax.experimental import pallas as pl
from jax.experimental.pallas import tpu as pltpu


def _round_up(n, m):
    return ((n + m - 1) // m) * m


# ---------------------------------------------------------------------------
# Kernel: one batch tile of the full MLP (trunk + 1 or 2 Q heads).
# ---------------------------------------------------------------------------
def _qnet_twin_kernel(x_ref, w1_ref, wh_ref, wo_ref, bh_ref, bo_ref, *q_refs):
    """x_ref : [TB, S_pad]            f32 zero-padded state tile
       w1_ref: [S_pad, M_pad]         bf16 (state -> mid)
       wh_ref: [1+nh, M_pad, M_pad]   bf16 (w2, w3[, w5])
       wo_ref: [nh, M_pad, A_pad]     bf16 (w4[, w6])
       bh_ref: [8, M_pad]             f32 rows (b1, b2, b3, b5, 0...)
       bo_ref: [8, A_pad]             f32 rows (b4, b6, 0...)
       q_refs: nh lane-dense [TB, A_pad] f32 outputs
    """
    wdt = w1_ref.dtype

    def dense(h, w, b_row, relu):
        # bf16 matmul on the MXU with f32 accumulation; bias + ReLU stay in
        # f32 on the VPU (v5e has no bf16 VALU).
        y = jnp.dot(h.astype(wdt), w, preferred_element_type=jnp.float32)
        y = y + b_row
        return jnp.maximum(y, 0.0) if relu else y

    h = dense(x_ref[...], w1_ref[...], bh_ref[0:1, :], True)      # state -> mid
    h = dense(h, wh_ref[0], bh_ref[1:2, :], True)                 # mid   -> mid
    for i, q_ref in enumerate(q_refs):                            # Q heads
        hi = dense(h, wh_ref[1 + i], bh_ref[2 + i:3 + i, :], True)
        q_ref[...] = dense(hi, wo_ref[i], bo_ref[i:i + 1, :], False)


# ---------------------------------------------------------------------------
# Tile / VMEM budgeting helpers
# ---------------------------------------------------------------------------
def _activation_vmem_bytes(tb, s_pad, m_pad, a_pad, num_heads):
    io = 2 * tb * (s_pad + num_heads * a_pad) * 4   # double-buffered in/out tiles
    inter = 5 * tb * m_pad * 4                      # f32 intermediates in the body
    return io + inter


def _pick_batch_tile(B, s_pad, m_pad, a_pad, num_heads, weight_bytes,
                     budget=24 << 20):
    TB = min(512, _round_up(B, 8))
    # v7x has 2 TensorCores: keep >= 2 "parallel" grid tiles whenever there is
    # enough batch to split (no effect on single-core v5e / v6e).
    if B >= 16 and pl.cdiv(B, TB) < 2:
        TB = _round_up(pl.cdiv(B, 2), 8)
    # Shrink the batch tile until resident weights (x2 for the pipeline's
    # buffers) + activation tiles fit the VMEM budget.
    while TB > 8 and (2 * weight_bytes
                      + _activation_vmem_bytes(TB, s_pad, m_pad, a_pad,
                                               num_heads)) > budget:
        TB = max(8, _round_up(TB // 2, 8))
    return TB


# ---------------------------------------------------------------------------
# Wrapper
# ---------------------------------------------------------------------------
def _run_heads(state, packed, num_heads):
    v = packed["variants"][num_heads]
    W1, WH, WO = packed["W1"], v["WH"], v["WO"]
    BH, BO = packed["BH"], packed["BO"]
    S_pad, M_pad, A_pad = packed["S_pad"], packed["M_pad"], packed["A_pad"]
    state_dim, action_dim = packed["state_dim"], packed["action_dim"]
    B = state.shape[0]

    weight_bytes = (W1.size * W1.dtype.itemsize
                    + WH.size * WH.dtype.itemsize
                    + WO.size * WO.dtype.itemsize
                    + BH.size * 4 + BO.size * 4)

    TB = _pick_batch_tile(B, S_pad, M_pad, A_pad, num_heads, weight_bytes)
    B_pad = _round_up(B, TB)
    n_tiles = B_pad // TB

    # Zero-pad the activations once (features -> S_pad lanes, rows -> B_pad).
    x_pad = jnp.zeros((B_pad, S_pad), jnp.float32).at[:B, :state_dim].set(
        state.astype(jnp.float32))

    flops = 2 * B_pad * (S_pad * M_pad
                         + (1 + num_heads) * M_pad * M_pad
                         + num_heads * M_pad * A_pad)
    bytes_accessed = (x_pad.size * 4 + num_heads * B_pad * A_pad * 4
                      + weight_bytes)

    vmem_need = (2 * weight_bytes
                 + _activation_vmem_bytes(TB, S_pad, M_pad, A_pad, num_heads)
                 + (4 << 20))
    vmem_limit = int(min(max(vmem_need, 32 << 20), 48 << 20))

    grid_spec = pltpu.PrefetchScalarGridSpec(
        num_scalar_prefetch=0,
        grid=(n_tiles,),
        in_specs=[
            pl.BlockSpec((TB, S_pad), lambda i: (i, 0)),     # activation tile
            pl.BlockSpec(W1.shape, lambda i: (0, 0)),        # resident weights
            pl.BlockSpec(WH.shape, lambda i: (0, 0, 0)),
            pl.BlockSpec(WO.shape, lambda i: (0, 0, 0)),
            pl.BlockSpec(BH.shape, lambda i: (0, 0)),        # resident biases
            pl.BlockSpec(BO.shape, lambda i: (0, 0)),
        ],
        out_specs=[pl.BlockSpec((TB, A_pad), lambda i: (i, 0))
                   for _ in range(num_heads)],
    )

    out_shape = tuple(jax.ShapeDtypeStruct((B_pad, A_pad), jnp.float32)
                      for _ in range(num_heads))

    outs = pl.pallas_call(
        _qnet_twin_kernel,
        out_shape=out_shape,
        grid_spec=grid_spec,
        compiler_params=pltpu.CompilerParams(
            dimension_semantics=("parallel",),
            vmem_limit_bytes=vmem_limit),
        cost_estimate=pl.CostEstimate(
            flops=flops, transcendentals=0, bytes_accessed=bytes_accessed),
    )(x_pad, W1, WH, WO, BH, BO)

    return tuple(o[:B, :action_dim] for o in outs)


def qnet_twin_forward(state, packed):
    """QNetTwin.forward(state) -> q1 (only the 4 needed weight mats are read)."""
    return _run_heads(state, packed, num_heads=1)[0]


def qnet_twin_get_q1_q2(state, packed):
    """QNetTwin.get_q1_q2(state) -> (q1, q2); trunk computed once, one launch."""
    return _run_heads(state, packed, num_heads=2)


# ---------------------------------------------------------------------------
# Parameter init (PyTorch-style) and one-time padding / packing.
# ---------------------------------------------------------------------------
def init_params(key, state_dim, mid_dim, action_dim):
    """U(-1/sqrt(fan_in), +1/sqrt(fan_in)) like nn.Linear; W is [in, out]."""
    def linear(k, fan_in, fan_out):
        kw, kb = jax.random.split(k)
        bound = 1.0 / jnp.sqrt(jnp.float32(fan_in))
        w = jax.random.uniform(kw, (fan_in, fan_out), jnp.float32, -bound, bound)
        b = jax.random.uniform(kb, (1, fan_out), jnp.float32, -bound, bound)
        return w, b

    ks = jax.random.split(key, 6)
    p = {}
    p["w1"], p["b1"] = linear(ks[0], state_dim, mid_dim)    # net_state[0]
    p["w2"], p["b2"] = linear(ks[1], mid_dim, mid_dim)      # net_state[2]
    p["w3"], p["b3"] = linear(ks[2], mid_dim, mid_dim)      # net_q1[0]
    p["w4"], p["b4"] = linear(ks[3], mid_dim, action_dim)   # net_q1[2]
    p["w5"], p["b5"] = linear(ks[4], mid_dim, mid_dim)      # net_q2[0]
    p["w6"], p["b6"] = linear(ks[5], mid_dim, action_dim)   # net_q2[2]
    return p


def pack_params(p, state_dim, mid_dim, action_dim, weight_dtype=jnp.bfloat16):
    """Shape-specific zero-padding + stacking, done once off the hot path.
    Weights are stored in bf16 (f32 accumulation happens in the kernel);
    zero-padded lanes stay exactly zero through every layer."""
    S_pad = _round_up(state_dim, 128)
    M_pad = _round_up(mid_dim, 128)
    A_pad = _round_up(action_dim, 128)

    def pad_w(w, rows, cols):
        z = jnp.zeros((rows, cols), jnp.float32)
        return z.at[:w.shape[0], :w.shape[1]].set(w).astype(weight_dtype)

    def pad_b(b, cols):
        return jnp.zeros((cols,), jnp.float32).at[:b.shape[1]].set(b[0])

    W1 = pad_w(p["w1"], S_pad, M_pad)
    w2 = pad_w(p["w2"], M_pad, M_pad)
    w3 = pad_w(p["w3"], M_pad, M_pad)
    w5 = pad_w(p["w5"], M_pad, M_pad)
    w4 = pad_w(p["w4"], M_pad, A_pad)
    w6 = pad_w(p["w6"], M_pad, A_pad)

    # Bias rows, leading dim padded to 8 sublanes (negligible size, shared by
    # both head variants). Hidden rows: b1, b2, b3, b5.  Output rows: b4, b6.
    BH = jnp.zeros((8, M_pad), jnp.float32)
    BH = BH.at[0].set(pad_b(p["b1"], M_pad)).at[1].set(pad_b(p["b2"], M_pad))
    BH = BH.at[2].set(pad_b(p["b3"], M_pad)).at[3].set(pad_b(p["b5"], M_pad))
    BO = jnp.zeros((8, A_pad), jnp.float32)
    BO = BO.at[0].set(pad_b(p["b4"], A_pad)).at[1].set(pad_b(p["b6"], A_pad))

    variants = {
        1: dict(WH=jnp.stack([w2, w3]), WO=jnp.stack([w4])),          # forward()
        2: dict(WH=jnp.stack([w2, w3, w5]), WO=jnp.stack([w4, w6])),  # get_q1_q2()
    }
    return dict(W1=W1, BH=BH, BO=BO, variants=variants,
                S_pad=S_pad, M_pad=M_pad, A_pad=A_pad,
                state_dim=state_dim, mid_dim=mid_dim, action_dim=action_dim)


# ---------------------------------------------------------------------------
# Pure-JAX references (unpadded).
# ---------------------------------------------------------------------------
def reference_q1_q2(state, p, weight_dtype=jnp.float32):
    def dense(h, w, b, relu):
        y = jnp.dot(h.astype(weight_dtype), w.astype(weight_dtype),
                    preferred_element_type=jnp.float32) + b
        return jnp.maximum(y, 0.0) if relu else y

    t = dense(state, p["w1"], p["b1"], True)
    t = dense(t, p["w2"], p["b2"], True)
    q1 = dense(dense(t, p["w3"], p["b3"], True), p["w4"], p["b4"], False)
    q2 = dense(dense(t, p["w5"], p["b5"], True), p["w6"], p["b6"], False)
    return q1, q2


if __name__ == "__main__":
    # CartPole-like dims (state_dim=4, action_dim=2); mid_dim=256 exercises the
    # shape-specific padding (M_pad=256 != S_pad=A_pad=128); batch=50 exercises
    # batch padding and a 2-tile parallel grid.
    batch, state_dim, mid_dim, action_dim = 50, 4, 256, 2

    key = jax.random.PRNGKey(0)
    k_params, k_state = jax.random.split(key)
    params = init_params(k_params, state_dim, mid_dim, action_dim)
    packed = pack_params(params, state_dim, mid_dim, action_dim)
    state = jax.random.normal(k_state, (batch, state_dim), jnp.float32)

    # forward() -> q1 (single head: w5/w6 never leave HBM)
    q1 = jax.block_until_ready(qnet_twin_forward(state, packed))
    # get_q1_q2() -> (q1, q2), twin head fused into ONE kernel launch
    q1_b, q2_b = jax.block_until_ready(qnet_twin_get_q1_q2(state, packed))

    # Matched-precision reference (bf16 weights, f32 accumulation): tight tol.
    q1_m, q2_m = reference_q1_q2(state, params, weight_dtype=jnp.bfloat16)
    # Full-f32 reference: loose tolerance (bf16 weight rounding ~1e-2 rel).
    q1_f, q2_f = reference_q1_q2(state, params, weight_dtype=jnp.float32)

    assert q1.shape == (batch, action_dim)
    assert q1_b.shape == (batch, action_dim) and q2_b.shape == (batch, action_dim)
    assert jnp.allclose(q1, q1_m, atol=2e-3, rtol=2e-3), "forward vs bf16 ref"
    assert jnp.allclose(q1_b, q1_m, atol=2e-3, rtol=2e-3), "q1 vs bf16 ref"
    assert jnp.allclose(q2_b, q2_m, atol=2e-3, rtol=2e-3), "q2 vs bf16 ref"
    assert jnp.allclose(q1_b, q1_f, atol=5e-2, rtol=5e-2), "q1 vs f32 ref"
    assert jnp.allclose(q2_b, q2_f, atol=5e-2, rtol=5e-2), "q2 vs f32 ref"

    print("KERNEL_OK")
</pallas_src>

<mosaic_0001>
module attributes {stable_mosaic.version = 11 : i64} {
  func.func @_qnet_twin_kernel(%arg0: i32, %arg1: memref<32x128xf32, #tpu.memory_space<vmem>>, %arg2: memref<128x256xbf16, #tpu.memory_space<vmem>>, %arg3: memref<2x256x256xbf16, #tpu.memory_space<vmem>>, %arg4: memref<1x256x128xbf16, #tpu.memory_space<vmem>>, %arg5: memref<8x256xf32, #tpu.memory_space<vmem>>, %arg6: memref<8x128xf32, #tpu.memory_space<vmem>>, %arg7: memref<32x128xf32, #tpu.memory_space<vmem>>) attributes {dimension_semantics = [#tpu.dimension_semantics<parallel>], iteration_bounds = array<i64: 2>, scalar_prefetch = 0 : i64, scratch_operands = 0 : i64, tpu.core_type = #tpu.core_type<tc>, window_params = [{transform_indices = @transform_0, window_bounds = array<i64: 32, 128>}, {pipeline_mode = #tpu.pipeline_mode<synchronous>, transform_indices = @transform_1, window_bounds = array<i64: 128, 256>}, {pipeline_mode = #tpu.pipeline_mode<synchronous>, transform_indices = @transform_2, window_bounds = array<i64: 2, 256, 256>}, {pipeline_mode = #tpu.pipeline_mode<synchronous>, transform_indices = @transform_3, window_bounds = array<i64: 1, 256, 128>}, {pipeline_mode = #tpu.pipeline_mode<synchronous>, transform_indices = @transform_4, window_bounds = array<i64: 8, 256>}, {pipeline_mode = #tpu.pipeline_mode<synchronous>, transform_indices = @transform_5, window_bounds = array<i64: 8, 128>}, {transform_indices = @transform_6, window_bounds = array<i64: 32, 128>}]} {
    %c0 = arith.constant 0 : index
    %c0_0 = arith.constant 0 : index
    %0 = vector.load %arg1[%c0, %c0_0] : memref<32x128xf32, #tpu.memory_space<vmem>>, vector<32x128xf32>
    %c0_1 = arith.constant 0 : index
    %c0_2 = arith.constant 0 : index
    %1 = vector.load %arg2[%c0_1, %c0_2] : memref<128x256xbf16, #tpu.memory_space<vmem>>, vector<128x256xbf16>
    %c0_3 = arith.constant 0 : index
    %c0_4 = arith.constant 0 : index
    %2 = vector.load %arg5[%c0_3, %c0_4] : memref<8x256xf32, #tpu.memory_space<vmem>>, vector<1x256xf32>
    %3 = arith.truncf %0 : vector<32x128xf32> to vector<32x128xbf16>
    %cst = arith.constant dense<0.000000e+00> : vector<32x256xf32>
    %4 = tpu.matmul %3, %1, %cst {dimension_numbers = #tpu.dot_dimension_numbers<[1], [0], [0], [1], [0, 0, 1, 1], [], []>} : vector<32x128xbf16>, vector<128x256xbf16>, vector<32x256xf32> -> vector<32x256xf32>
    %5 = vector.broadcast %2 : vector<1x256xf32> to vector<32x256xf32>
    %6 = arith.addf %4, %5 : vector<32x256xf32>
    %cst_5 = arith.constant 0.000000e+00 : f32
    %7 = vector.broadcast %cst_5 : f32 to vector<32x256xf32>
    %8 = arith.maximumf %6, %7 : vector<32x256xf32>
    %c0_6 = arith.constant 0 : index
    %c0_7 = arith.constant 0 : index
    %c0_8 = arith.constant 0 : index
    %9 = vector.load %arg3[%c0_6, %c0_7, %c0_8] : memref<2x256x256xbf16, #tpu.memory_space<vmem>>, vector<1x256x256xbf16>
    %10 = vector.shape_cast %9 : vector<1x256x256xbf16> to vector<256x256xbf16>
    %c1 = arith.constant 1 : index
    %c0_9 = arith.constant 0 : index
    %11 = vector.load %arg5[%c1, %c0_9] : memref<8x256xf32, #tpu.memory_space<vmem>>, vector<1x256xf32>
    %12 = arith.truncf %8 : vector<32x256xf32> to vector<32x256xbf16>
    %cst_10 = arith.constant dense<0.000000e+00> : vector<32x256xf32>
    %13 = tpu.matmul %12, %10, %cst_10 {dimension_numbers = #tpu.dot_dimension_numbers<[1], [0], [0], [1], [0, 0, 1, 1], [], []>} : vector<32x256xbf16>, vector<256x256xbf16>, vector<32x256xf32> -> vector<32x256xf32>
    %14 = vector.broadcast %11 : vector<1x256xf32> to vector<32x256xf32>
    %15 = arith.addf %13, %14 : vector<32x256xf32>
    %cst_11 = arith.constant 0.000000e+00 : f32
    %16 = vector.broadcast %cst_11 : f32 to vector<32x256xf32>
    %17 = arith.maximumf %15, %16 : vector<32x256xf32>
    %c1_12 = arith.constant 1 : index
    %c0_13 = arith.constant 0 : index
    %c0_14 = arith.constant 0 : index
    %18 = vector.load %arg3[%c1_12, %c0_13, %c0_14] : memref<2x256x256xbf16, #tpu.memory_space<vmem>>, vector<1x256x256xbf16>
    %19 = vector.shape_cast %18 : vector<1x256x256xbf16> to vector<256x256xbf16>
    %c2 = arith.constant 2 : index
    %c0_15 = arith.constant 0 : index
    %20 = vector.load %arg5[%c2, %c0_15] : memref<8x256xf32, #tpu.memory_space<vmem>>, vector<1x256xf32>
    %21 = arith.truncf %17 : vector<32x256xf32> to vector<32x256xbf16>
    %cst_16 = arith.constant dense<0.000000e+00> : vector<32x256xf32>
    %22 = tpu.matmul %21, %19, %cst_16 {dimension_numbers = #tpu.dot_dimension_numbers<[1], [0], [0], [1], [0, 0, 1, 1], [], []>} : vector<32x256xbf16>, vector<256x256xbf16>, vector<32x256xf32> -> vector<32x256xf32>
    %23 = vector.broadcast %20 : vector<1x256xf32> to vector<32x256xf32>
    %24 = arith.addf %22, %23 : vector<32x256xf32>
    %cst_17 = arith.constant 0.000000e+00 : f32
    %25 = vector.broadcast %cst_17 : f32 to vector<32x256xf32>
    %26 = arith.maximumf %24, %25 : vector<32x256xf32>
    %c0_18 = arith.constant 0 : index
    %c0_19 = arith.constant 0 : index
    %c0_20 = arith.constant 0 : index
    %27 = vector.load %arg4[%c0_18, %c0_19, %c0_20] : memref<1x256x128xbf16, #tpu.memory_space<vmem>>, vector<1x256x128xbf16>
    %28 = vector.shape_cast %27 : vector<1x256x128xbf16> to vector<256x128xbf16>
    %c0_21 = arith.constant 0 : index
    %c0_22 = arith.constant 0 : index
    %29 = vector.load %arg6[%c0_21, %c0_22] : memref<8x128xf32, #tpu.memory_space<vmem>>, vector<1x128xf32>
    %30 = arith.truncf %26 : vector<32x256xf32> to vector<32x256xbf16>
    %cst_23 = arith.constant dense<0.000000e+00> : vector<32x128xf32>
    %31 = tpu.matmul %30, %28, %cst_23 {dimension_numbers = #tpu.dot_dimension_numbers<[1], [0], [0], [1], [0, 0, 1, 1], [], []>} : vector<32x256xbf16>, vector<256x128xbf16>, vector<32x128xf32> -> vector<32x128xf32>
    %32 = vector.broadcast %29 : vector<1x128xf32> to vector<32x128xf32>
    %33 = arith.addf %31, %32 : vector<32x128xf32>
    %c0_24 = arith.constant 0 : index
    %c0_25 = arith.constant 0 : index
    %34 = vector.load %arg7[%c0_24, %c0_25] : memref<32x128xf32, #tpu.memory_space<vmem>>, vector<32x128xf32>
    tpu.vector_store %arg7[%c0_24, %c0_25], %33 {strides = array<i32>} : memref<32x128xf32, #tpu.memory_space<vmem>>, vector<32x128xf32>,
    return
  }
  func.func @transform_0(%arg0: i32) -> (i32, i32) {
    %c0_i32 = arith.constant 0 : i32
    %c0_i32_0 = arith.constant 0 : i32
    return %arg0, %c0_i32 : i32, i32
  }
  func.func @transform_1(%arg0: i32) -> (i32, i32) {
    %c0_i32 = arith.constant 0 : i32
    %c0_i32_0 = arith.constant 0 : i32
    %c0_i32_1 = arith.constant 0 : i32
    return %c0_i32, %c0_i32_0 : i32, i32
  }
  func.func @transform_2(%arg0: i32) -> (i32, i32, i32) {
    %c0_i32 = arith.constant 0 : i32
    %c0_i32_0 = arith.constant 0 : i32
    %c0_i32_1 = arith.constant 0 : i32
    %c0_i32_2 = arith.constant 0 : i32
    return %c0_i32, %c0_i32_0, %c0_i32_1 : i32, i32, i32
  }
  func.func @transform_3(%arg0: i32) -> (i32, i32, i32) {
    %c0_i32 = arith.constant 0 : i32
    %c0_i32_0 = arith.constant 0 : i32
    %c0_i32_1 = arith.constant 0 : i32
    %c0_i32_2 = arith.constant 0 : i32
    return %c0_i32, %c0_i32_0, %c0_i32_1 : i32, i32, i32
  }
  func.func @transform_4(%arg0: i32) -> (i32, i32) {
    %c0_i32 = arith.constant 0 : i32
    %c0_i32_0 = arith.constant 0 : i32
    %c0_i32_1 = arith.constant 0 : i32
    return %c0_i32, %c0_i32_0 : i32, i32
  }
  func.func @transform_5(%arg0: i32) -> (i32, i32) {
    %c0_i32 = arith.constant 0 : i32
    %c0_i32_0 = arith.constant 0 : i32
    %c0_i32_1 = arith.constant 0 : i32
    return %c0_i32, %c0_i32_0 : i32, i32
  }
  func.func @transform_6(%arg0: i32) -> (i32, i32) {
    %c0_i32 = arith.constant 0 : i32
    %c0_i32_0 = arith.constant 0 : i32
    return %arg0, %c0_i32 : i32, i32
  }
}

</mosaic_0001>

<bundles_post_ra>
// kernel: tpu_custom_call.1
= control target key start
LH: loop header
LB: loop body
LE: loop exit
PB: predicated region body
PF: predicated region fallthrough
CT: control target
= control target key end

     0   :  { %11 = vsyncpa [#allocation3], 0  ;;  %s2320_s0 = inlined_call_operand.hbm [shape: f32[64,128], index: 0, kind: input, shape index: {}]   ;;  %s2321_s1 = inlined_call_operand.hbm [shape: bf16[128,256], index: 1, kind: input, shape index: {}]   ;;  %s2322_s2 = inlined_call_operand.hbm [shape: bf16[2,256,256], index: 2, kind: input, shape index: {}]   ;;  %s2323_s3 = inlined_call_operand.hbm [shape: bf16[1,256,128], index: 3, kind: input, shape index: {}]   ;;  %s2324_s4 = inlined_call_operand.hbm [shape: f32[8,256], index: 4, kind: input, shape index: {}]   ;;  %s2325_s5 = inlined_call_operand.vmem [shape: f32[8,128], index: 5, kind: input, shape index: {}]   ;;  %s2326_s6 = inlined_call_operand.hbm [shape: f32[64,128], index: 6, kind: output, shape index: {}]  }
   0x1   :  { %13 = vsyncpa [#allocation3 + $0x1], 0 }
   0x2   :  { %14 = vsyncpa [#allocation6], 0 }
   0x3   :  { %15 = vsyncpa [#allocation9], 0 }
   0x4   :  { %16 = vsyncpa [#allocation4], 0 }
   0x5   :  { %18 = vsyncpa [#allocation4 + $0x1], 0  ;;  %s2005_s21 = smov 0   ;;  %s2007_s22 = smov 0  }
   0x6   :  { %s2009_s23 = smov 0   ;;  %s2011_s24 = smov 0  }
   0x7 LB: > { %s2026_s25 = sadd.s32 4294967295, %s1955_s24   ;;  %s1360_s26 = sadd.s32 4294967294, %s1955_s24   ;;  %s1955_s24 = sphi %s2011_s24, %s2355_s24   ;;  %s1951_s23 = sphi %s2009_s23, %s2354_s23   ;;  %s1947_s22 = sphi %s2007_s22, %s2353_s22   ;;  %s1943_s21 = sphi %s2005_s21, %s2352_s21  }
   0x8   : > { %p44_p0 = scmp.ne.s32.totalorder %s1947_s22, %s1943_s21  ;;  %p2327_p1 = scmp.eq.s32.totalorder %s2026_s25, 0 }
   0x9   : > { %p179_p3 = scmp.eq.s32.totalorder %s1360_s26, 1  ;;  %p1361_p5 = scmp.ge.s32.totalorder %s1955_s24, 1 }
   0xa   : > { %p2035_p4 = por %p2327_p1, %p44_p0  ;;  %p186_p7 = scmp.lt.s32.totalorder %s1955_s24, 3 }
   0xb   : > { %p2040_p6 = por %p179_p3, %p44_p0  ;;  %s1957_s30 = smov [#allocation5]  }
   0xc   : > { %s2334_s27 = scalar_select %p2035_p4, 1, 0 }
   0xd   : > { %s2335_s28 = scalar_select %p2040_p6, 1, 0 }
   0xe   : > { %p2045_p8 = pnand %p1361_p5, %p186_p7  ;;  %s198_s7 = sshll.u32 %s1957_s30, 4  ;;  %s2049_s7 = int_to_ptr.vmem [resolvable:$true] %s198_s7 }
   0xf   : > { %s1958_s9 = smov [#allocation8]   ;;  %s1739_s13 = scalar_lea.hbm %s2321_s1, 2048 }
  0x10   : > { %s2336_s29 = scalar_select %p2045_p8, 1, 0 }
  0x11   : > { %p1529_p9 = pneg %p2045_p8  ;;  %s224_s10 = sshll.u32 %s1958_s9, 4  ;;  %s2060_s10 = int_to_ptr.vmem [resolvable:$true] %s224_s10 }
  0x12   : > { %p1740_p12 = scmp.ne.s32.totalorder %s2321_s1, %s1739_s13  ;;  %p1746_p5 = scmp.lt.u32.totalorder %s1739_s13, %s2321_s1 }
  0x13   : > { %p2056_p11 = pnand %p1529_p9, %p2327_p1 }
  0x15   : > { %p2070_p13 = pneg %p2056_p11 }
  0x17   : > { %p1742_p0 = pnand %p2070_p13, %p1740_p12 }
  0x19   : > { %p1743_p3 = pneg %p1742_p0 }
  0x1b   : > { %p1748_p7 = pnand %p1746_p5, %p1743_p3 }
  0x1d   : > { %1751 = shalt.err (!%p1748_p7)
}
  0x1e   : > { %s1752_s19 = scalar_lea.vmem %s2049_s7, 2048  ;;  %p1760_p2 = scmp.lt.s32.totalorder %s2049_s7, %s2049_s7 }
  0x1f   : > { %p1753_p9 = scmp.ne.s32.totalorder %s2049_s7, %s1752_s19  ;;  %p1761_p6 = scmp.lt.s32.totalorder %s1752_s19, %s1752_s19 }
  0x21   : > { %p1755_p10 = pnand %p1753_p9, %p2070_p13  ;;  %p1762_p12 = por %p1761_p6, %p1760_p2 }
  0x23   : > { %p1756_p1 = pneg %p1755_p10 }
  0x25   : > { %p1763_p0 = pnand %p1762_p12, %p1756_p1 }
  0x27   : > { %1766 = shalt.err (!%p1763_p0)
}
  0x28   : > { %s2328_s20 = smov 128   ;;  %s2330_s26 = smov 8  }
  0x29   : > { %1532 = dma.hbm_to_vmem [thread:$0]  (!%p2056_p11), %s2321_s1, 2048, %s2049_s7, [#allocation6], %s2328_s20, %s2328_s20, %s2330_s26  }
  0x2a   : > { %s1767_s13 = scalar_lea.hbm %s2323_s3, 2048 }
  0x2b   : > { %p1768_p1 = scmp.ne.s32.totalorder %s2323_s3, %s1767_s13  ;;  %p1774_p10 = scmp.lt.u32.totalorder %s1767_s13, %s2323_s3 }
  0x2d   : > { %p1770_p2 = pnand %p1768_p1, %p2070_p13 }
  0x2f   : > { %p1771_p6 = pneg %p1770_p2 }
  0x31   : > { %p1776_p3 = pnand %p1774_p10, %p1771_p6 }
  0x33   : > { %1779 = shalt.err (!%p1776_p3)
}
  0x34   : > { %s1780_s7 = scalar_lea.vmem %s2060_s10, 2048  ;;  %p1788_p12 = scmp.lt.s32.totalorder %s2060_s10, %s2060_s10 }
  0x35   : > { %p1781_p5 = scmp.ne.s32.totalorder %s2060_s10, %s1780_s7  ;;  %p1789_p0 = scmp.lt.s32.totalorder %s1780_s7, %s1780_s7 }
  0x37   : > { %p1783_p7 = pnand %p1781_p5, %p2070_p13  ;;  %p1790_p1 = por %p1789_p0, %p1788_p12 }
  0x39   : > { %p1784_p9 = pneg %p1783_p7 }
  0x3b   : > { %p1791_p2 = pnand %p1790_p1, %p1784_p9 }
  0x3d   : > { %1794 = shalt.err (!%p1791_p2)
}
  0x3e   : > { %s1961_s19 = smov 64   ;;  %s1962_s30 = smov 4  }
  0x3f   : > { %1538 = dma.hbm_to_vmem [thread:$0]  (!%p2056_p11), %s2323_s3, 2048, %s2060_s10, [#allocation9], %s1961_s19, %s1961_s19, %s1962_s30  }
  0x40   : > { %s1963_s12 = smov [#allocation7]   ;;  %s1964_s14 = smov [#allocation10]  }
  0x41   : > { %s211_s13 = sshll.u32 %s1963_s12, 4  ;;  %s238_s15 = sshll.u32 %s1964_s14, 4  ;;  %s212_s13 = int_to_ptr.vmem [resolvable:$true] %s211_s13  ;;  %s2117_s15 = int_to_ptr.vmem [resolvable:$true] %s238_s15 }
  0x42   : > { %s1795_s7 = scalar_lea.hbm %s2322_s2, 8192 }
  0x43   : > { %p1796_p6 = scmp.ne.s32.totalorder %s2322_s2, %s1795_s7  ;;  %p1802_p5 = scmp.lt.u32.totalorder %s1795_s7, %s2322_s2 }
  0x45   : > { %p1798_p10 = pnand %p1796_p6, %p2070_p13 }
  0x47   : > { %p1799_p3 = pneg %p1798_p10 }
  0x49   : > { %p1804_p7 = pnand %p1802_p5, %p1799_p3 }
  0x4b   : > { %1807 = shalt.err (!%p1804_p7)
}
  0x4c   : > { %s1808_s19 = scalar_lea.vmem %s212_s13, 8192  ;;  %p1816_p1 = scmp.lt.s32.totalorder %s212_s13, %s212_s13 }
  0x4d   : > { %p1809_p9 = scmp.ne.s32.totalorder %s212_s13, %s1808_s19  ;;  %p1817_p2 = scmp.lt.s32.totalorder %s1808_s19, %s1808_s19 }
  0x4f   : > { %p1811_p12 = pnand %p1809_p9, %p2070_p13  ;;  %p1818_p4 = por %p1817_p2, %p1816_p1 }
  0x51   : > { %p1812_p0 = pneg %p1811_p12 }
  0x53   : > { %p1819_p8 = pnand %p1818_p4, %p1812_p0 }
  0x55   : > { %1822 = shalt.err (!%p1819_p8)
}
  0x56   : > { %s2339_s20 = smov 8   ;;  %s2340_s26 = smov 128  }
  0x57   : > { %1535 = dma.hbm_to_vmem [thread:$0]  (!%p2056_p11), %s2322_s2, 8192, %s212_s13, [#allocation6], %s2340_s26, %s2340_s26, %s2339_s20  }
  0x58   : > { %s1823_s17 = scalar_lea.hbm %s2324_s4, 256 }
  0x59   : > { %p1824_p6 = scmp.ne.s32.totalorder %s2324_s4, %s1823_s17  ;;  %p1830_p10 = scmp.lt.u32.totalorder %s1823_s17, %s2324_s4 }
  0x5b   : > { %p1826_p4 = pnand %p1824_p6, %p2070_p13 }
  0x5d   : > { %p1827_p8 = pneg %p1826_p4 }
  0x5f   : > { %p1832_p3 = pnand %p1830_p10, %p1827_p8 }
  0x61   : > { %1835 = shalt.err (!%p1832_p3)
}
  0x62   : > { %s1836_s13 = scalar_lea.vmem %s2117_s15, 256  ;;  %p1844_p12 = scmp.lt.s32.totalorder %s2117_s15, %s2117_s15 }
  0x63   : > { %p1837_p5 = scmp.ne.s32.totalorder %s2117_s15, %s1836_s13  ;;  %p1845_p0 = scmp.lt.s32.totalorder %s1836_s13, %s1836_s13 }
  0x65   : > { %p1839_p7 = pnand %p1837_p5, %p2070_p13  ;;  %p1846_p1 = por %p1845_p0, %p1844_p12 }
  0x67   : > { %p1840_p9 = pneg %p1839_p7 }
  0x69   : > { %p1847_p2 = pnand %p1846_p1, %p1840_p9 }
  0x6b   : > { %1850 = shalt.err (!%p1847_p2)
}
  0x6c   : > { %1541 = dma.hbm_to_vmem [thread:$0]  (!%p2056_p11), %s2324_s4, 256, %s2117_s15, [#allocation9]  }
  0x6d   : > { %s2164_s16 = sadd.s32 1, %s1955_s24   ;;  %s31_s11 = sadd.s32 1, %s1951_s23 }
  0x6e   : > { %s28_s8 = ssub.s32 %s1955_s24, %s2164_s16  ;;  %p38_p6 = scmp.ne.s32.totalorder %s1951_s23, %s1947_s22 }
  0x6f   : > { %p29_p13 = scmp.eq.s32.totalorder %s28_s8, 0  ;;  %p39_p4 = scmp.eq.s32.totalorder %s1955_s24, 0 }
  0x70   : > { %p2341_p10 = scmp.eq.s32.totalorder %s2026_s25, 1  ;;  %p1554_p5 = scmp.lt.s32.totalorder %s1955_s24, 2 }
  0x71   : > { %s2173_s12 = scalar_select %p29_p13, %s1951_s23, %s31_s11  }
  0x72   : > { %p40_p8 = por %p39_p4, %p38_p6  ;;  %p2177_p3 = por %p2341_p10, %p38_p6 }
  0x73   : > { %s252_s17 = sand.u32 1, %s1951_s23   ;;  %s1479_s15 = sshll.u32 %s1955_s24, 9 }
  0x74   : > { %s1367_s18 = sshll.u32 %s252_s17, 5  ;;  %s2187_s10 = scalar_lea.hbm %s2320_s0, %s1479_s15 }
  0x75   : > { %s256_s13 = scalar_lea.vmem [#allocation2], %s1367_s18  ;;  %p2191_p11 = pnand %p1554_p5, %p40_p8 }
  0x76   : > { %s263_s19 = sshll.u32 %s256_s13, 4  ;;  %s2195_s8 = scalar_lea.sflag [#allocation3], %s252_s17  ;;  %s2189_s19 = int_to_ptr.vmem [resolvable:$true] %s263_s19 }
  0x77   : > { %s1851_s11 = scalar_lea.hbm %s2187_s10, 512  ;;  %p1853_p9 = pneg %p2191_p11 }
  0x78   : > { %p1852_p7 = scmp.ne.s32.totalorder %s2187_s10, %s1851_s11  ;;  %s1856_s7 = scalar_lea.hbm %s2320_s0, 1024 }
  0x79   : > { %p1857_p1 = scmp.lt.u32.totalorder %s2187_s10, %s2320_s0  ;;  %p1858_p2 = scmp.lt.u32.totalorder %s1856_s7, %s1851_s11 }
  0x7a   : > { %p1854_p12 = pnand %p1853_p9, %p1852_p7  ;;  %p1860_p6 = scmp.lt.u32.totalorder %s1851_s11, %s2187_s10 }
  0x7b   : > { %p1859_p13 = por %p1858_p2, %p1857_p1 }
  0x7c   : > { %p1855_p0 = pneg %p1854_p12 }
  0x7d   : > { %p1861_p4 = por %p1860_p6, %p1859_p13 }
  0x7f   : > { %p1862_p8 = pnand %p1861_p4, %p1855_p0 }
  0x81   : > { %1865 = shalt.err (!%p1862_p8)
}
  0x82   : > { %s1866_s17 = scalar_lea.vmem %s2189_s19, 512  ;;  %s1965_s18 = smov [#allocation2]  }
  0x83   : > { %p1867_p10 = scmp.ne.s32.totalorder %s2189_s19, %s1866_s17  ;;  %s1871_s15 = sshll.u32 %s1965_s18, 4  ;;  %s1872_s15 = int_to_ptr.vmem [resolvable:$false] %s1871_s15 }
  0x84   : > { %s1873_s9 = scalar_lea.vmem %s1872_s15, 1024  ;;  %p1874_p12 = scmp.lt.s32.totalorder %s2189_s19, %s1872_s15 }
  0x85   : > { %p1869_p5 = pnand %p1867_p10, %p1853_p9  ;;  %p1875_p1 = scmp.lt.s32.totalorder %s1873_s9, %s1866_s17 }
  0x87   : > { %p1870_p7 = pneg %p1869_p5  ;;  %p1876_p2 = por %p1875_p1, %p1874_p12 }
  0x89   : > { %p1877_p13 = pnand %p1876_p2, %p1870_p7 }
  0x8b   : > { %1880 = shalt.err (!%p1877_p13)
}
  0x8c   : > { %1545 = dma.hbm_to_vmem [thread:$0]  (!%p2191_p11), %s2187_s10, 512, %s2189_s19, %s2195_s8, %s2340_s26, %s2340_s26, %s2339_s20  }
  0x8d   : > { %p2344_p9 = scmp.ne.s32.totalorder %s2336_s29, 0 }
  0x8e   : > { %s2229_s11 = sand.u32 (!%p2344_p9), 1, %s1947_s22   ;;  %p2345_p0 = scmp.ne.s32.totalorder (!%p2344_p9), %s2334_s27, 0 }
  0x8f   : > { %275 = sbr.rel (%p2344_p9) target bundleno = 1099 (0x44b), region = 44  ;;  %s1371_s7 = sshll.u32 (!%p2344_p9), %s2229_s11, 5 }
  0x90   : > { %s278_s13 = scalar_lea.sflag (!%p2344_p9), [#allocation3], %s2229_s11  ;;  %s2235_s30 = scalar_lea.vmem (!%p2344_p9), [#allocation2], %s1371_s7 }
  0x96   : > { %1926 = dma.done.wait (%p2345_p0), %s278_s13, 512  }
  0x97   : > { %1928 = vsyncadd (%p2345_p0), %s278_s13, 4294966784  ;;  %p2346_p11 = scmp.eq.s32.totalorder %s2026_s25, 0 }
  0x99   : > { %1930 = dma.done.wait (%p2346_p11), [#allocation6], 10240   ;;  %p2347_p6 = pmov %p2346_p11 }
  0x9b   : > { %1932 = vsyncadd (%p2347_p6), [#allocation6], 4294957056  ;;  %p2348_p4 = pmov %p2347_p6 }
  0x9d   : > { %1934 = dma.done.wait (%p2348_p4), [#allocation9], 2304   ;;  %p2349_p8 = pmov %p2348_p4 }
  0x9e   : > { %v1966_v0 = vmov 0   ;;  %v1603_v1 = vld [vmem:[#allocation5 + $0x4] ss:$8 sps:$4 sm:$0xff]   ;;  %v1605_v2 = vld [vmem:[#allocation5] ss:$8 sps:$4 sm:$0xff]   ;;  %v331_v33 = vld [vmem:[%s2235_s30 + $0x10] sm:$0xff] }
  0x9f   : > { %1936 = vsyncadd (%p2349_p8), [#allocation9], 4294964992  ;;  %475 = vmatprep.mubr.bf16.mxu0 %v1966_v0  ;;  %443 = vmatprep.subr.bf16.mxu0 %v1603_v1  ;;  %v1606_v3 = vld [vmem:[#allocation5 + $0x14] ss:$8 sps:$4 sm:$0xff]   ;;  %v1608_v4 = vld [vmem:[#allocation5 + $0x10] ss:$8 sps:$4 sm:$0xff]  }
  0xa0   : > { %444 = vmatpush1.bf16.msra.mxu0 %v1605_v2  ;;  %v1609_v5 = vld [vmem:[#allocation5 + $0x24] ss:$8 sps:$4 sm:$0xff]   ;;  %v1611_v6 = vld [vmem:[#allocation5 + $0x20] ss:$8 sps:$4 sm:$0xff]   ;;  %v1612_v7 = vld [vmem:[#allocation5 + $0x34] ss:$8 sps:$4 sm:$0xff]  }
  0xa1   : > { %445 = vmatprep.subr.bf16.mxu0 %v1606_v3  ;;  %v1614_v8 = vld [vmem:[#allocation5 + $0x30] ss:$8 sps:$4 sm:$0xff]   ;;  %v1615_v9 = vld [vmem:[#allocation5 + $0x44] ss:$8 sps:$4 sm:$0xff]   ;;  %v1629_v11 = vld [vmem:[#allocation7] ss:$8 sps:$4 sm:$0xff]  }
  0xa2   : > { %v1627_v10 = vld [vmem:[#allocation7 + $0x4] ss:$8 sps:$4 sm:$0xff]   ;;  %v1617_v12 = vld [vmem:[#allocation5 + $0x40] ss:$8 sps:$4 sm:$0xff]   ;;  %v1630_v13 = vld [vmem:[#allocation7 + $0x14] ss:$8 sps:$4 sm:$0xff]  }
  0xa3   : > { %713 = vmatprep.subr.bf16.mxu1 %v1627_v10  ;;  %v1618_v14 = vld [vmem:[#allocation5 + $0x54] ss:$8 sps:$4 sm:$0xff]   ;;  %v1632_v15 = vld [vmem:[#allocation7 + $0x10] ss:$8 sps:$4 sm:$0xff]   ;;  %v1633_v16 = vld [vmem:[#allocation7 + $0x24] ss:$8 sps:$4 sm:$0xff]  }
  0xa4   : > { %446 = vmatpush1.bf16.msra.mxu0 %v1608_v4  ;;  %714 = vmatpush1.bf16.msra.mxu1 %v1629_v11  ;;  %v1620_v17 = vld [vmem:[#allocation5 + $0x50] ss:$8 sps:$4 sm:$0xff]   ;;  %v1621_v18 = vld [vmem:[#allocation5 + $0x64] ss:$8 sps:$4 sm:$0xff]   ;;  %v1635_v19 = vld [vmem:[#allocation7 + $0x20] ss:$8 sps:$4 sm:$0xff]  }
  0xa5   : > { %447 = vmatprep.subr.bf16.mxu0 %v1609_v5  ;;  %715 = vmatprep.subr.bf16.mxu1 %v1630_v13  ;;  %v1636_v20 = vld [vmem:[#allocation7 + $0x34] ss:$8 sps:$4 sm:$0xff]   ;;  %v1623_v21 = vld [vmem:[#allocation5 + $0x60] ss:$8 sps:$4 sm:$0xff]   ;;  %v1638_v23 = vld [vmem:[#allocation7 + $0x30] ss:$8 sps:$4 sm:$0xff]  }
  0xa6   : > { %v1624_v22 = vld [vmem:[#allocation5 + $0x74] ss:$8 sps:$4 sm:$0xff]   ;;  %v1639_v24 = vld [vmem:[#allocation7 + $0x44] ss:$8 sps:$4 sm:$0xff]   ;;  %v1626_v25 = vld [vmem:[#allocation5 + $0x70] ss:$8 sps:$4 sm:$0xff]  }
  0xa7   : > { %v329_v26 = vld [vmem:[%s2235_s30] sm:$0xff]  ;;  %v330_v27 = vld [vmem:[%s2235_s30 + $0x8] sm:$0xff]  ;;  %v1642_v29 = vld [vmem:[#allocation7 + $0x54] ss:$8 sps:$4 sm:$0xff]   ;;  %s325_s20 = scalar_lea.vmem [#allocation11], %s1371_s7  ;;  %s1480_s10 = sshll.u32 %s2026_s25, 9 }
  0xa8   : > { %448 = vmatpush1.bf16.msra.mxu0 %v1611_v6  ;;  %716 = vmatpush1.bf16.msra.mxu1 %v1632_v15  ;;  %v1641_v28 = vld [vmem:[#allocation7 + $0x40] ss:$8 sps:$4 sm:$0xff]   ;;  %v350_v30 = vpack.c.bf16 %v330_v27, %v329_v26  ;;  %v1644_v31 = vld [vmem:[#allocation7 + $0x50] ss:$8 sps:$4 sm:$0xff]   ;;  %v1645_v32 = vld [vmem:[#allocation7 + $0x64] ss:$8 sps:$4 sm:$0xff]   ;;  %s2276_s17 = scalar_lea.hbm %s2326_s6, %s1480_s10 }
  0xa9   : > { %449 = vmatprep.subr.bf16.mxu0 %v1612_v7  ;;  %717 = vmatprep.subr.bf16.mxu1 %v1633_v16  ;;  %v332_v34 = vld [vmem:[%s2235_s30 + $0x18] sm:$0xff]  ;;  %v1647_v35 = vld [vmem:[#allocation7 + $0x60] ss:$8 sps:$4 sm:$0xff]   ;;  %v1651_v39 = vld [vmem:[#allocation7 + $0x84] ss:$8 sps:$4 sm:$0xff]   ;;  %s1249_s26 = sshll.u32 %s325_s20, 4  ;;  %s2271_s26 = int_to_ptr.vmem [resolvable:$true] %s1249_s26 }
  0xaa   : > { %v1648_v36 = vld [vmem:[#allocation7 + $0x74] ss:$8 sps:$4 sm:$0xff]   ;;  %v1650_v37 = vld [vmem:[#allocation7 + $0x70] ss:$8 sps:$4 sm:$0xff]   ;;  %v351_v38 = vpack.c.bf16 %v332_v34, %v331_v33  ;;  %v1653_v40 = vld [vmem:[#allocation7 + $0x80] ss:$8 sps:$4 sm:$0xff]  }
  0xab   : > { %v1654_v41 = vld [vmem:[#allocation7 + $0x94] ss:$8 sps:$4 sm:$0xff]   ;;  %v1656_v42 = vld [vmem:[#allocation7 + $0x90] ss:$8 sps:$4 sm:$0xff]   ;;  %v1657_v43 = vld [vmem:[#allocation7 + $0xa4] ss:$8 sps:$4 sm:$0xff]  }
  0xac   : > { %450 = vmatpush1.bf16.msra.mxu0 %v1614_v8  ;;  %718 = vmatpush1.bf16.msra.mxu1 %v1635_v19  ;;  %v1659_v44 = vld [vmem:[#allocation7 + $0xa0] ss:$8 sps:$4 sm:$0xff]   ;;  %v1660_v45 = vld [vmem:[#allocation7 + $0xb4] ss:$8 sps:$4 sm:$0xff]   ;;  %v1662_v46 = vld [vmem:[#allocation7 + $0xb0] ss:$8 sps:$4 sm:$0xff]   ;;  %v353_v19 = vlaneseq }
  0xad   : > { %451 = vmatprep.subr.bf16.mxu0 %v1615_v9  ;;  %719 = vmatprep.subr.bf16.mxu1 %v1636_v20  ;;  %v1663_v47 = vld [vmem:[#allocation7 + $0xc4] ss:$8 sps:$4 sm:$0xff]   ;;  %v1665_v48 = vld [vmem:[#allocation7 + $0xc0] ss:$8 sps:$4 sm:$0xff]   ;;  %v1666_v49 = vld [vmem:[#allocation7 + $0xd4] ss:$8 sps:$4 sm:$0xff]  }
  0xae   : > { %v1668_v50 = vld [vmem:[#allocation7 + $0xd0] ss:$8 sps:$4 sm:$0xff]   ;;  %v1669_v51 = vld [vmem:[#allocation7 + $0xe4] ss:$8 sps:$4 sm:$0xff]   ;;  %v1671_v52 = vld [vmem:[#allocation7 + $0xe0] ss:$8 sps:$4 sm:$0xff]  }
  0xaf   : > { %v1672_v53 = vld [vmem:[#allocation7 + $0xf4] ss:$8 sps:$4 sm:$0xff]   ;;  %v1674_v54 = vld [vmem:[#allocation7 + $0xf0] ss:$8 sps:$4 sm:$0xff]   ;;  %v1675_v55 = vld [vmem:[#allocation7 + $0x100] ss:$8 sps:$4 sm:$0xff]  }
  0xb0   : > { %452 = vmatpush1.bf16.msra.mxu0 %v1617_v12  ;;  %720 = vmatpush1.bf16.msra.mxu1 %v1638_v23  ;;  %v1677_v56 = vld [vmem:[#allocation7 + $0x104] ss:$8 sps:$4 sm:$0xff]   ;;  %v1680_v57 = vld [vmem:[#allocation7 + $0x114] ss:$8 sps:$4 sm:$0xff]   ;;  %v1678_v58 = vld [vmem:[#allocation7 + $0x110] ss:$8 sps:$4 sm:$0xff]  }
  0xb1   : > { %453 = vmatprep.subr.bf16.mxu0 %v1618_v14  ;;  %721 = vmatprep.subr.bf16.mxu1 %v1639_v24  ;;  %v1683_v59 = vld [vmem:[#allocation7 + $0x124] ss:$8 sps:$4 sm:$0xff]   ;;  %v1681_v60 = vld [vmem:[#allocation7 + $0x120] ss:$8 sps:$4 sm:$0xff]   ;;  %v1686_v61 = vld [vmem:[#allocation7 + $0x134] ss:$8 sps:$4 sm:$0xff]  }
  0xb2   : > { %v1684_v62 = vld [vmem:[#allocation7 + $0x130] ss:$8 sps:$4 sm:$0xff]   ;;  %v1689_v63 = vld [vmem:[#allocation7 + $0x144] ss:$8 sps:$4 sm:$0xff]   ;;  %v1692_v1 = vld [vmem:[#allocation7 + $0x154] ss:$8 sps:$4 sm:$0xff]  }
  0xb3   : > { %v1690_v2 = vld [vmem:[#allocation7 + $0x150] ss:$8 sps:$4 sm:$0xff]   ;;  %v1695_v3 = vld [vmem:[#allocation7 + $0x164] ss:$8 sps:$4 sm:$0xff]   ;;  %v1693_v4 = vld [vmem:[#allocation7 + $0x160] ss:$8 sps:$4 sm:$0xff]  }
  0xb4   : > { %454 = vmatpush1.bf16.msra.mxu0 %v1620_v17  ;;  %722 = vmatpush1.bf16.msra.mxu1 %v1641_v28  ;;  %v1698_v5 = vld [vmem:[#allocation7 + $0x174] ss:$8 sps:$4 sm:$0xff]   ;;  %v1696_v6 = vld [vmem:[#allocation7 + $0x170] ss:$8 sps:$4 sm:$0xff]   ;;  %v1701_v7 = vld [vmem:[#allocation7 + $0x184] ss:$8 sps:$4 sm:$0xff]  }
  0xb5   : > { %455 = vmatprep.subr.bf16.mxu0 %v1621_v18  ;;  %723 = vmatprep.subr.bf16.mxu1 %v1642_v29  ;;  %v1699_v8 = vld [vmem:[#allocation7 + $0x180] ss:$8 sps:$4 sm:$0xff]   ;;  %v1704_v9 = vld [vmem:[#allocation7 + $0x194] ss:$8 sps:$4 sm:$0xff]   ;;  %v1702_v10 = vld [vmem:[#allocation7 + $0x190] ss:$8 sps:$4 sm:$0xff]  }
  0xb6   : > { %v1707_v11 = vld [vmem:[#allocation7 + $0x1a4] ss:$8 sps:$4 sm:$0xff]   ;;  %v1705_v12 = vld [vmem:[#allocation7 + $0x1a0] ss:$8 sps:$4 sm:$0xff]   ;;  %v1710_v13 = vld [vmem:[#allocation7 + $0x1b4] ss:$8 sps:$4 sm:$0xff]  }
  0xb7   : > { %v1708_v14 = vld [vmem:[#allocation7 + $0x1b0] ss:$8 sps:$4 sm:$0xff]   ;;  %v1713_v15 = vld [vmem:[#allocation7 + $0x1c4] ss:$8 sps:$4 sm:$0xff]   ;;  %v1711_v16 = vld [vmem:[#allocation7 + $0x1c0] ss:$8 sps:$4 sm:$0xff]  }
  0xb8   : > { %456 = vmatpush1.bf16.msra.mxu0 %v1623_v21  ;;  %724 = vmatpush1.bf16.msra.mxu1 %v1644_v31  ;;  %v1716_v17 = vld [vmem:[#allocation7 + $0x1d4] ss:$8 sps:$4 sm:$0xff]   ;;  %v1714_v18 = vld [vmem:[#allocation7 + $0x1d0] ss:$8 sps:$4 sm:$0xff]   ;;  %v354_v20 = vshrl.u32 %v353_v19, 7  ;;  %s1236_s18 = scalar_lea.sflag [#allocation4], %s2229_s11 }
  0xb9   : > { %457 = vmatprep.subr.bf16.mxu0 %v1624_v22  ;;  %725 = vmatprep.subr.bf16.mxu1 %v1645_v32  ;;  %v349_v22 = vld [vmem:[#allocation10] ss:$8 sm:$0x3]  ;;  %s1881_s15 = scalar_lea.vmem %s2271_s26, 512  ;;  %s1967_s25 = smov [#allocation11]  }
  0xba   : > { %v2255_v21 = vsub.s32 0, %v354_v20  ;;  %v2257_v23 = vsub.s32 1, %v354_v20  ;;  %p1882_p10 = scmp.ne.s32.totalorder %s2271_s26, %s1881_s15  ;;  %s1885_s9 = sshll.u32 %s1967_s25, 4  ;;  %s1886_s9 = int_to_ptr.vmem [resolvable:$false] %s1885_s9 }
  0xbb   : > { %s1887_s7 = scalar_lea.vmem %s1886_s9, 1024  ;;  %p1888_p12 = scmp.lt.s32.totalorder %s2271_s26, %s1886_s9 }
  0xbc   : > { %458 = vmatpush1.bf16.msra.mxu0 %v1626_v25  ;;  %726 = vmatpush1.bf16.msra.mxu1 %v1647_v35  ;;  %v356_v24 = vrot.slane %v349_v22, %v2255_v21  ;;  %v360_v25 = vrot.slane %v349_v22, %v2257_v23  ;;  %p1883_p5 = pnand %p1882_p10, %p2177_p3  ;;  %p1889_p1 = scmp.lt.s32.totalorder %s1887_s7, %s1881_s15 }
  0xbd   : > { %727 = vmatprep.subr.bf16.mxu1 %v1648_v36  ;;  %984 = vmatprep.subr.bf16.mxu0 %v1677_v56  ;;  %v1722_v56 = vld [vmem:[#allocation7 + $0x1f4] ss:$8 sps:$4 sm:$0xff]  }
  0xbe   : > { %p1884_p7 = pneg %p1883_p5  ;;  %p1890_p2 = por %p1889_p1, %p1888_p12 }
  0xbf   : > { %476 = vmatmul.mubr.bf16.vlgmr.msra.gmra.mrb[0].mxu0 %v350_v30 }
  0xc0   : > { %485 = vmatprep.mubr.bf16.mxu0 %v1966_v0  ;;  %728 = vmatpush1.bf16.msra.mxu1 %v1650_v37  ;;  %v1687_v0 = vld [vmem:[#allocation7 + $0x140] ss:$8 sps:$4 sm:$0xff]   ;;  %p1891_p13 = pnand %p1890_p2, %p1884_p7 }
  0xc1   : > { %729 = vmatprep.subr.bf16.mxu1 %v1651_v39  ;;  %985 = vmatpush1.bf16.msra.mxu0 %v1675_v55  ;;  %v1717_v55 = vld [vmem:[#allocation7 + $0x1e0] ss:$8 sps:$4 sm:$0xff]  }
  0xc2   : > { %986 = vmatprep.subr.bf16.mxu0 %v1680_v57  ;;  %v1720_v57 = vld [vmem:[#allocation7 + $0x1f0] ss:$8 sps:$4 sm:$0xff]  }
  0xc4   : > { %730 = vmatpush1.bf16.msra.mxu1 %v1653_v40 }
  0xc5   : > { %731 = vmatprep.subr.bf16.mxu1 %v1654_v41  ;;  %987 = vmatpush1.bf16.msra.mxu0 %v1678_v58  ;;  %v1723_v58 = vld [vmem:[#allocation8 + $0x40] sm:$0xff]  }
  0xc6   : > { %988 = vmatprep.subr.bf16.mxu0 %v1683_v59  ;;  %v1724_v59 = vld [vmem:[#allocation8] sm:$0xff]  }
  0xc7   : > { %486 = vmatmul.mubr.bf16.gmra.mrb[4].mxu0 %v351_v38 }
  0xc8   : > { %732 = vmatpush1.bf16.msra.mxu1 %v1656_v42 }
  0xc9   : > { %733 = vmatprep.subr.bf16.mxu1 %v1657_v43  ;;  %989 = vmatpush1.bf16.msra.mxu0 %v1681_v60  ;;  %v1725_v60 = vld [vmem:[#allocation8 + $0x48] sm:$0xff]  }
  0xca   : > { %990 = vmatprep.subr.bf16.mxu0 %v1686_v61  ;;  %v1726_v61 = vld [vmem:[#allocation8 + $0x8] sm:$0xff]  }
  0xcc   : > { %734 = vmatpush1.bf16.msra.mxu1 %v1659_v44 }
  0xcd   : > { %735 = vmatprep.subr.bf16.mxu1 %v1660_v45  ;;  %991 = vmatpush1.bf16.msra.mxu0 %v1684_v62  ;;  %v1727_v62 = vld [vmem:[#allocation8 + $0x50] sm:$0xff]  }
  0xce   : > { %992 = vmatprep.subr.bf16.mxu0 %v1689_v63  ;;  %v1728_v63 = vld [vmem:[#allocation8 + $0x10] sm:$0xff]  }
  0xd0   : > { %736 = vmatpush1.bf16.msra.mxu1 %v1662_v46 }
  0xd1   : > { %737 = vmatprep.subr.bf16.mxu1 %v1663_v47  ;;  %993 = vmatpush1.bf16.msra.mxu0 %v1687_v0  ;;  %v1729_v0 = vld [vmem:[#allocation8 + $0x58] sm:$0xff]  }
  0xd2   : > { %994 = vmatprep.subr.bf16.mxu0 %v1692_v1  ;;  %v1730_v1 = vld [vmem:[#allocation8 + $0x18] sm:$0xff]  }
  0xd4   : > { %738 = vmatpush1.bf16.msra.mxu1 %v1665_v48 }
  0xd5   : > { %739 = vmatprep.subr.bf16.mxu1 %v1666_v49  ;;  %995 = vmatpush1.bf16.msra.mxu0 %v1690_v2  ;;  %v1731_v2 = vld [vmem:[#allocation8 + $0x60] sm:$0xff]  }
  0xd6   : > { %996 = vmatprep.subr.bf16.mxu0 %v1695_v3  ;;  %v1732_v3 = vld [vmem:[#allocation8 + $0x20] sm:$0xff]  }
  0xd8   : > { %740 = vmatpush1.bf16.msra.mxu1 %v1668_v50 }
  0xd9   : > { %741 = vmatprep.subr.bf16.mxu1 %v1669_v51  ;;  %997 = vmatpush1.bf16.msra.mxu0 %v1693_v4  ;;  %v1733_v4 = vld [vmem:[#allocation8 + $0x68] sm:$0xff]  }
  0xda   : > { %998 = vmatprep.subr.bf16.mxu0 %v1698_v5  ;;  %v537_v5 = vld [vmem:[#allocation10 + $0x1] ss:$8 sm:$0x3] }
  0xdc   : > { %742 = vmatpush1.bf16.msra.mxu1 %v1671_v52 }
  0xdd   : > { %743 = vmatprep.subr.bf16.mxu1 %v1672_v53  ;;  %999 = vmatpush1.bf16.msra.mxu0 %v1696_v6  ;;  %v546_v6 = vrot.slane %v537_v5, %v2255_v21 }
  0xde   : > { %1000 = vmatprep.subr.bf16.mxu0 %v1701_v7  ;;  %v550_v7 = vrot.slane %v537_v5, %v2257_v23 }
  0xe0   : > { %744 = vmatpush1.bf16.msra.mxu1 %v1674_v54  ;;  %v1719_v54 = vld [vmem:[#allocation7 + $0x1e4] ss:$8 sps:$4 sm:$0xff]  }
  0xe1   : > { %1001 = vmatpush1.bf16.msra.mxu0 %v1699_v8  ;;  %1481 = vmatprep.subr.bf16.mxu1 %v1723_v58 }
  0xe2   : > { %1002 = vmatprep.subr.bf16.mxu0 %v1704_v9 }
  0xe5   : > { %1003 = vmatpush1.bf16.msra.mxu0 %v1702_v10 }
  0xe6   : > { %1004 = vmatprep.subr.bf16.mxu0 %v1707_v11 }
  0xe9   : > { %1005 = vmatpush1.bf16.msra.mxu0 %v1705_v12 }
  0xea   : > { %1006 = vmatprep.subr.bf16.mxu0 %v1710_v13 }
  0xed   : > { %1007 = vmatpush1.bf16.msra.mxu0 %v1708_v14 }
  0xee   : > { %1008 = vmatprep.subr.bf16.mxu0 %v1713_v15 }
  0xf1   : > { %1009 = vmatpush1.bf16.msra.mxu0 %v1711_v16 }
  0xf2   : > { %1010 = vmatprep.subr.bf16.mxu0 %v1716_v17 }
  0xf5   : > { %1011 = vmatpush1.bf16.msra.mxu0 %v1714_v18 }
  0xf6   : > { %1012 = vmatprep.subr.bf16.mxu0 %v1719_v54 }
  0xf9   : > { %1013 = vmatpush1.bf16.msra.mxu0 %v1717_v55 }
  0xfa   : > { %1014 = vmatprep.subr.bf16.mxu0 %v1722_v56 }
  0xfd   : > { %1015 = vmatpush1.bf16.msra.mxu0 %v1720_v57 }
 0x192   : > { %v477_v26 = vpop.f32.mrb[0].mxu0 }
 0x193   : > { %v478_v27 = vadd.f32 %v477_v26, %v356_v24  ;;  %v479_v28 = vpop.f32.mrb[1].mxu0 }
 0x194   : > { %v480_v29 = vadd.f32 %v479_v28, %v360_v25  ;;  %v481_v30 = vpop.f32.mrb[2].mxu0 }
 0x195   : > { %v482_v31 = vadd.f32 %v481_v30, %v356_v24  ;;  %v483_v32 = vpop.f32.mrb[3].mxu0  ;;  %v496_v34 = vmax.f32 %v478_v27, 0.0 }
 0x196   : > { %v484_v33 = vadd.f32 %v483_v32, %v360_v25  ;;  %v497_v36 = vmax.f32 %v480_v29, 0.0 }
 0x197   : > { %v498_v35 = vmax.f32 %v482_v31, 0.0 }
 0x198   : > { %v499_v37 = vmax.f32 %v484_v33, 0.0 }
 0x199   : > { %v538_v38 = vpack.c.bf16 %v498_v35, %v496_v34 }
 0x19a   : > { %v487_v39 = vpop.f32.mrb[4].mxu0  ;;  %v539_v40 = vpack.c.bf16 %v499_v37, %v497_v36 }
 0x19b   : > { %v488_v41 = vadd.f32 %v487_v39, %v356_v24  ;;  %v489_v42 = vpop.f32.mrb[5].mxu0  ;;  %v1735_v39 = vld [vmem:[#allocation8 + $0x70] sm:$0xff]  }
 0x19c   : > { %v490_v43 = vadd.f32 %v489_v42, %v360_v25  ;;  %v491_v44 = vpop.f32.mrb[6].mxu0  ;;  %745 = vmatprep.mubr.bf16.mxu1 %v539_v40  ;;  %v1736_v40 = vld [vmem:[#allocation8 + $0x30] sm:$0xff]   ;;  %v1738_v42 = vld [vmem:[#allocation8 + $0x38] sm:$0xff]  }
 0x19d   : > { %v492_v45 = vadd.f32 %v491_v44, %v356_v24  ;;  %v493_v46 = vpop.f32.mrb[7].mxu0  ;;  %746 = vmatmul.mubr.bf16.vlgmr.msra.gmra.mrb[0].mxu1 %v538_v38  ;;  %v500_v48 = vmax.f32 %v488_v41, 0.0  ;;  %v1734_v38 = vld [vmem:[#allocation8 + $0x28] sm:$0xff]   ;;  %v1737_v41 = vld [vmem:[#allocation8 + $0x78] sm:$0xff]  }
 0x19e   : > { %v494_v47 = vadd.f32 %v493_v46, %v360_v25  ;;  %v501_v50 = vmax.f32 %v490_v43, 0.0  ;;  %1482 = vmatpush3.bf16.msra.mxu1 %v1724_v59  ;;  %v808_v43 = vld [vmem:[#allocation10 + $0x2] ss:$8 sm:$0x3] }
 0x19f   : > { %v502_v49 = vmax.f32 %v492_v45, 0.0  ;;  %1483 = vmatprep.subr.bf16.mxu1 %v1725_v60  ;;  %v817_v44 = vrot.slane %v808_v43, %v2255_v21  ;;  %v821_v45 = vrot.slane %v808_v43, %v2257_v23 }
 0x1a0   : > { %v503_v51 = vmax.f32 %v494_v47, 0.0 }
 0x1a1   : > { %v540_v52 = vpack.c.bf16 %v502_v49, %v500_v48 }
 0x1a2   : > { %v541_v53 = vpack.c.bf16 %v503_v51, %v501_v50  ;;  %1484 = vmatpush3.bf16.msra.mxu1 %v1726_v61 }
 0x1a3   : > { %1485 = vmatprep.subr.bf16.mxu1 %v1727_v62 }
 0x1a4   : > { %755 = vmatprep.mubr.bf16.mxu1 %v541_v53 }
 0x1a5   : > { %756 = vmatmul.mubr.bf16.gmra.mrb[4].mxu1 %v540_v52 }
 0x1a6   : > { %1486 = vmatpush3.bf16.msra.mxu1 %v1728_v63 }
 0x1a7   : > { %1487 = vmatprep.subr.bf16.mxu1 %v1729_v0 }
 0x1aa   : > { %1488 = vmatpush3.bf16.msra.mxu1 %v1730_v1 }
 0x1ab   : > { %1489 = vmatprep.subr.bf16.mxu1 %v1731_v2 }
 0x1ae   : > { %1490 = vmatpush3.bf16.msra.mxu1 %v1732_v3 }
 0x1af   : > { %1491 = vmatprep.subr.bf16.mxu1 %v1733_v4 }
 0x1b2   : > { %1492 = vmatpush3.bf16.msra.mxu1 %v1734_v38 }
 0x1b3   : > { %1493 = vmatprep.subr.bf16.mxu1 %v1735_v39 }
 0x1b6   : > { %1494 = vmatpush3.bf16.msra.mxu1 %v1736_v40 }
 0x1b7   : > { %1495 = vmatprep.subr.bf16.mxu1 %v1737_v41 }
 0x1ba   : > { %1496 = vmatpush3.bf16.msra.mxu1 %v1738_v42 }
 0x270   : > { %v747_v8 = vpop.f32.mrb[0].mxu1 }
 0x271   : > { %v748_v9 = vadd.f32 %v747_v8, %v546_v6  ;;  %v749_v10 = vpop.f32.mrb[1].mxu1 }
 0x272   : > { %v750_v11 = vadd.f32 %v749_v10, %v550_v7  ;;  %v751_v12 = vpop.f32.mrb[2].mxu1 }
 0x273   : > { %v752_v13 = vadd.f32 %v751_v12, %v546_v6  ;;  %v753_v14 = vpop.f32.mrb[3].mxu1  ;;  %v766_v16 = vmax.f32 %v748_v9, 0.0  ;;  %v1457_v9 = vld [vmem:[%s2325_s5] ss:$0 sm:$0xff] }
 0x274   : > { %v754_v15 = vadd.f32 %v753_v14, %v550_v7  ;;  %v767_v18 = vmax.f32 %v750_v11, 0.0 }
 0x275   : > { %v768_v17 = vmax.f32 %v752_v13, 0.0 }
 0x276   : > { %v769_v19 = vmax.f32 %v754_v15, 0.0 }
 0x277   : > { %v809_v20 = vpack.c.bf16 %v768_v17, %v766_v16 }
 0x278   : > { %v810_v22 = vpack.c.bf16 %v769_v19, %v767_v18  ;;  %v757_v24 = vpop.f32.mrb[4].mxu1 }
 0x279   : > { %v758_v25 = vadd.f32 %v757_v24, %v546_v6  ;;  %v759_v26 = vpop.f32.mrb[5].mxu1 }
 0x27a   : > { %v760_v27 = vadd.f32 %v759_v26, %v550_v7  ;;  %v761_v28 = vpop.f32.mrb[6].mxu1  ;;  %1016 = vmatprep.mubr.bf16.mxu0 %v810_v22 }
 0x27b   : > { %v762_v29 = vadd.f32 %v761_v28, %v546_v6  ;;  %v763_v30 = vpop.f32.mrb[7].mxu1  ;;  %1017 = vmatmul.mubr.bf16.vlgmr.msra.gmra.mrb[8].mxu0 %v809_v20  ;;  %v770_v32 = vmax.f32 %v758_v25, 0.0 }
 0x27c   : > { %v764_v31 = vadd.f32 %v763_v30, %v550_v7  ;;  %v771_v34 = vmax.f32 %v760_v27, 0.0 }
 0x27d   : > { %v772_v33 = vmax.f32 %v762_v29, 0.0 }
 0x27e   : > { %v773_v35 = vmax.f32 %v764_v31, 0.0 }
 0x27f   : > { %v811_v36 = vpack.c.bf16 %v772_v33, %v770_v32 }
 0x280   : > { %v812_v37 = vpack.c.bf16 %v773_v35, %v771_v34 }
 0x282   : > { %1026 = vmatprep.mubr.bf16.mxu0 %v812_v37 }
 0x283   : > { %1027 = vmatmul.mubr.bf16.gmra.mrb[12].mxu0 %v811_v36 }
 0x34e   : > { %v1018_v46 = vpop.f32.mrb[8].mxu0 }
 0x34f   : > { %v1019_v47 = vadd.f32 %v1018_v46, %v817_v44  ;;  %v1020_v48 = vpop.f32.mrb[9].mxu0 }
 0x350   : > { %v1021_v49 = vadd.f32 %v1020_v48, %v821_v45  ;;  %v1022_v50 = vpop.f32.mrb[10].mxu0 }
 0x351   : > { %v1023_v51 = vadd.f32 %v1022_v50, %v817_v44  ;;  %v1024_v52 = vpop.f32.mrb[11].mxu0  ;;  %v1037_v54 = vmax.f32 %v1019_v47, 0.0 }
 0x352   : > { %v1025_v53 = vadd.f32 %v1024_v52, %v821_v45  ;;  %v1038_v56 = vmax.f32 %v1021_v49, 0.0 }
 0x353   : > { %v1039_v55 = vmax.f32 %v1023_v51, 0.0 }
 0x354   : > { %v1040_v57 = vmax.f32 %v1025_v53, 0.0 }
 0x355   : > { %v1078_v58 = vpack.c.bf16 %v1039_v55, %v1037_v54 }
 0x356   : > { %v1079_v59 = vpack.c.bf16 %v1040_v57, %v1038_v56  ;;  %v1028_v60 = vpop.f32.mrb[12].mxu0 }
 0x357   : > { %v1029_v61 = vadd.f32 %v1028_v60, %v817_v44  ;;  %v1030_v62 = vpop.f32.mrb[13].mxu0 }
 0x358   : > { %v1031_v21 = vadd.f32 %v1030_v62, %v821_v45  ;;  %v1032_v63 = vpop.f32.mrb[14].mxu0  ;;  %1214 = vmatprep.mubr.bf16.mxu1 %v1079_v59 }
 0x359   : > { %v1033_v23 = vadd.f32 %v1032_v63, %v817_v44  ;;  %v1034_v0 = vpop.f32.mrb[15].mxu0  ;;  %1215 = vmatmul.mubr.bf16.vlgmr.msra.gmra.mrb[8].mxu1 %v1078_v58  ;;  %v1041_v2 = vmax.f32 %v1029_v61, 0.0 }
 0x35a   : > { %v1035_v1 = vadd.f32 %v1034_v0, %v821_v45  ;;  %v1042_v4 = vmax.f32 %v1031_v21, 0.0 }
 0x35b   : > { %v1043_v3 = vmax.f32 %v1033_v23, 0.0 }
 0x35c   : > { %v1044_v5 = vmax.f32 %v1035_v1, 0.0 }
 0x35d   : > { %v1080_v6 = vpack.c.bf16 %v1043_v3, %v1041_v2 }
 0x35e   : > { %v1081_v7 = vpack.c.bf16 %v1044_v5, %v1042_v4 }
 0x360   : > { %1222 = vmatprep.mubr.bf16.mxu1 %v1081_v7 }
 0x361   : > { %1223 = vmatmul.mubr.bf16.gmra.mrb[12].mxu1 %v1080_v6 }
 0x42c   : > { %v1497_v8 = vpop.f32.mrb[8].mxu1 }
 0x42d   : > { %v1498_v10 = vpop.f32.mrb[9].mxu1 }
 0x42e   : > { %v1499_v11 = vadd.f32 %v1498_v10, %v1497_v8  ;;  %v1500_v12 = vpop.f32.mrb[10].mxu1 }
 0x42f   : > { %v1501_v13 = vpop.f32.mrb[11].mxu1 }
 0x430   : > { %v1217_v14 = vadd.f32 %v1499_v11, %v1457_v9  ;;  %v1502_v15 = vadd.f32 %v1501_v13, %v1500_v12 }
 0x432   : > { %1231 = vst [vmem:[%s325_s20] sm:$0xff] %v1217_v14  ;;  %v1220_v16 = vadd.f32 %v1502_v15, %v1457_v9 }
 0x434   : > { %1232 = vst [vmem:[%s325_s20 + $0x8] sm:$0xff] %v1220_v16  ;;  %v1503_v17 = vpop.f32.mrb[12].mxu1 }
 0x435   : > { %v1504_v18 = vpop.f32.mrb[13].mxu1 }
 0x436   : > { %v1505_v19 = vadd.f32 %v1504_v18, %v1503_v17  ;;  %v1506_v20 = vpop.f32.mrb[14].mxu1 }
 0x437   : > { %v1507_v22 = vpop.f32.mrb[15].mxu1 }
 0x438   : > { %v1225_v24 = vadd.f32 %v1505_v19, %v1457_v9  ;;  %v1508_v25 = vadd.f32 %v1507_v22, %v1506_v20 }
 0x43a   : > { %1233 = vst [vmem:[%s325_s20 + $0x10] sm:$0xff] %v1225_v24  ;;  %v1228_v26 = vadd.f32 %v1508_v25, %v1457_v9 }
 0x43c   : > { %1234 = vst [vmem:[%s325_s20 + $0x18] sm:$0xff] %v1228_v26 }
 0x43d   : > { %1894 = shalt.err (!%p1891_p13)
}
 0x43e   : > { %s1895_s13 = scalar_lea.hbm %s2276_s17, 512  ;;  %s1899_s29 = scalar_lea.hbm %s2326_s6, 1024 }
 0x43f   : > { %p1896_p9 = scmp.ne.s32.totalorder %s2276_s17, %s1895_s13  ;;  %p1900_p6 = scmp.lt.u32.totalorder %s2276_s17, %s2326_s6 }
 0x440   : > { %p1901_p4 = scmp.lt.u32.totalorder %s1899_s29, %s1895_s13  ;;  %p1903_p10 = scmp.lt.u32.totalorder %s1895_s13, %s2276_s17 }
 0x441   : > { %p1897_p0 = pnand %p1896_p9, %p2177_p3 }
 0x442   : > { %p1902_p8 = por %p1901_p4, %p1900_p6 }
 0x443   : > { %p1898_p11 = pneg %p1897_p0 }
 0x444   : > { %p1904_p5 = por %p1903_p10, %p1902_p8 }
 0x446   : > { %p1905_p7 = pnand %p1904_p5, %p1898_p11 }
 0x448   : > { %1908 = shalt.err (!%p1905_p7)
}
 0x449   : > { %s1968_s19 = smov 128   ;;  %s1969_s8 = smov 8  }
 0x44a   : > { %1527 = dma.vmem_to_hbm [thread:$0]  (%p2177_p3), %s2271_s26, 512, %s2276_s17, %s1236_s18, %s1968_s19, %s1968_s19, %s1969_s8  }
 0x44b PF: > { %s1264_s15 = sand.u32 1, %s1943_s21   ;;  %p2350_p12 = scmp.ne.s32.totalorder %s2335_s28, 0 }
 0x44c   : > { %p2351_p1 = scmp.ge.s32.totalorder %s1955_s24, 2  ;;  %s1265_s25 = scalar_lea.sflag [#allocation4], %s1264_s15 }
 0x44e   : > { %p1547_p2 = pnand %p2351_p1, %p2350_p12 }
 0x450   : > { %1938 = dma.done.wait (!%p1547_p2), %s1265_s25, 512  }
 0x451   : > { %1940 = vsyncadd (!%p1547_p2), %s1265_s25, 4294966784  ;;  %p21_p13 = scmp.ge.s32.totalorder %s2164_s16, 4   ;;  %s2352_s21 = smov %s1947_s22 }
 0x452   : > { %s2353_s22 = smov %s1951_s23  ;;  %s2354_s23 = smov %s2173_s12 }
 0x453   : > { %s2355_s24 = smov %s2164_s16  ;;  %23 = sbr.rel (!%p21_p13) target bundleno = 7 (0x7), region = 108 }
 0x45a   :  { %1270 = vsyncpa [#allocation3], 1 }
 0x45b   :  { %1272 = vsyncpa [#allocation3 + $0x1], 1 }
 0x45c   :  { %1273 = vsyncpa [#allocation6], 1 }
 0x45d   :  { %1274 = vsyncpa [#allocation9], 1 }
 0x45e   :  { %1275 = vsyncpa [#allocation4], 1 }
 0x45f   :  { %1277 = vsyncpa [#allocation4 + $0x1], 1 }

</bundles_post_ra>
